<compile_context>
chip_gen: v6e
topology: v6e:2x2x1
jax: 0.10.0
libtpu: 0.0.40
codegen_flags: <defaults>
</compile_context>

<pallas_src>
import jax
import jax.numpy as jnp
from jax.experimental import pallas as pl
from jax.experimental.pallas import tpu as pltpu


def _round_up(x, m):
    return ((x + m - 1) // m) * m


def _physical_vmem_bytes():
    """Physical per-core VMEM; conservative 64 MiB (v7x per-TC) fallback."""
    try:
        return int(pltpu.get_tpu_info().vmem_capacity_bytes)
    except Exception:
        return 64 * 1024 * 1024


def make_ffn_kernel(n_sub, sub_tk, compute_dtype, use_scratch):
    """Build the per-(row tile i, d_ff tile k) kernel body."""

    def kernel(x_ref, w1_ref, b1_ref, w2_ref, b2_ref, o_ref, *scratch):
        # f32 accumulator: separate scratch only when the output is narrow;
        # otherwise accumulate directly into the resident output block.
        acc = scratch[0] if use_scratch else o_ref
        k = pl.program_id(1)

        @pl.when(k == 0)
        def _():
            acc[...] = jnp.zeros_like(acc)

        # In-kernel activation cast (saves a full-array HBM pass in the wrapper).
        x = x_ref[...].astype(compute_dtype)

        # Sub-chunk the d_ff tile: shortens the dot1 -> ReLU -> dot2 chain and
        # keeps the live f32 `h` at (tm, sub_tk) instead of (tm, tk).
        for j in range(n_sub):
            off = j * sub_tk  # static, multiple of 128 (or full tile)
            h = jnp.dot(x, w1_ref[:, pl.ds(off, sub_tk)],
                        preferred_element_type=jnp.float32)
            h = jnp.maximum(h + b1_ref[:, pl.ds(off, sub_tk)], 0.0)
            # dropout -> identity (inference / eval mode)
            acc[...] += jnp.dot(h.astype(compute_dtype),
                                w2_ref[pl.ds(off, sub_tk), :],
                                preferred_element_type=jnp.float32)

        @pl.when(k == pl.num_programs(1) - 1)
        def _():
            if use_scratch:
                o_ref[...] = (acc[...] + b2_ref[...]).astype(o_ref.dtype)
            else:
                o_ref[...] = acc[...] + b2_ref[...]

    return kernel


def _pick_row_tile(n, target):
    """Row tile: multiple of 8, <= target, and >= 2 tiles when possible
    (so the 'parallel' row axis can shard across both v7x TensorCores)."""
    tm = min(_round_up(target, 8), _round_up(n, 8))
    while tm > 8 and pl.cdiv(n, tm) < 2:
        tm = max(8, _round_up(tm // 2, 8))
    return tm


def _pick_ff_tile(d_ff, tk_max):
    """Return (tk, d_ff_padded).  Prefer an exact 128-multiple divisor of d_ff
    <= tk_max; otherwise pad d_ff with zeros (zero columns/rows contribute 0)."""
    tk_max = max(128, (tk_max // 128) * 128)
    if d_ff <= tk_max:
        return d_ff, d_ff
    tk = tk_max
    while tk >= 128:
        if d_ff % tk == 0:
            return tk, d_ff
        tk -= 128
    tk = tk_max
    return tk, pl.cdiv(d_ff, tk) * tk


def _pick_subchunks(tk):
    """2-4 sub-chunks of >=128 lanes when the tile allows it."""
    for n_sub in (4, 2):
        if tk % (n_sub * 128) == 0:
            return n_sub
    return 1


def positionwise_feed_forward(x, w1, b1, w2, b2, *, tm=512, tk=2048,
                              compute_dtype=jnp.bfloat16, weight_buffers=2):
    """x: (batch, seq, d_model) -> (batch, seq, d_model).

    tm: row tile — the primary throughput knob (weight streams are amortized
        over tm rows).  512 is a good default on v6e/v7x; 256 suffices on v5e.
    tk: upper bound on the d_ff chunk; automatically shrunk so double-buffered
        W1+W2 tiles fit the physical VMEM budget (v7x-safe).
    compute_dtype: MXU input dtype (bf16 on v6e/v7x); accumulation is f32.
        Pass weights already stored in compute_dtype to avoid per-call casts.
    weight_buffers: >2 requests deeper pipelining of the weight streams
        (useful on v6e's 128 MiB VMEM if weight DMA is still exposed).
    """
    batch, seq, d_model = x.shape
    d_ff = w1.shape[1]
    n = batch * seq
    out_dtype = x.dtype

    cd_bytes = jnp.dtype(compute_dtype).itemsize
    x_bytes = jnp.dtype(x.dtype).itemsize
    out_bytes = jnp.dtype(out_dtype).itemsize

    phys_vmem = _physical_vmem_bytes()
    vmem_budget = int(phys_vmem * 0.8)  # ~20% headroom vs. physical capacity

    # d_ff tile: double-buffered W1+W2 tiles (4 * d_model * tk * cd) must stay
    # under ~half of the budget, leaving room for a large row tile.
    tk_cap = max(128, (vmem_budget // 2) // (4 * d_model * cd_bytes))
    tk_eff, d_ff_pad = _pick_ff_tile(d_ff, min(tk, tk_cap))
    n_sub = _pick_subchunks(tk_eff)
    sub_tk = tk_eff // n_sub

    tm_eff = _pick_row_tile(n, tm)
    use_scratch = out_dtype != jnp.float32

    def vmem_estimate(tm_e):
        return (
            2 * tm_e * d_model * x_bytes              # x tiles (double-buffered)
            + 2 * d_model * tk_eff * cd_bytes         # W1 tiles
            + 2 * tk_eff * d_model * cd_bytes         # W2 tiles
            + 2 * (tk_eff + d_model) * 4              # bias tiles
            + 2 * tm_e * d_model * out_bytes          # output tiles
            + (tm_e * d_model * 4 if use_scratch else 0)  # f32 accumulator
            + tm_e * d_model * cd_bytes               # in-kernel cast of x
            + tm_e * sub_tk * 4                       # live f32 h sub-chunk
        )

    # Shrink the row tile (never tk's lane-density) until the estimate fits.
    while tm_eff > 8 and vmem_estimate(tm_eff) > vmem_budget:
        tm_eff = max(8, _round_up(tm_eff // 2, 8))

    vmem_est = vmem_estimate(tm_eff)
    vmem_limit = int(min(vmem_budget, max(32 * 1024 * 1024, int(vmem_est * 1.25))))
    vmem_limit = max(vmem_limit, vmem_est)

    # --- prepare operands (pad rows / d_ff only when strictly needed) ---
    x2d = x.reshape(n, d_model)
    n_pad = pl.cdiv(n, tm_eff) * tm_eff
    if n_pad != n:
        x2d = jnp.pad(x2d, ((0, n_pad - n), (0, 0)))

    # Weights: cast only if the caller did not already store them in
    # compute_dtype (avoids a per-call full-array HBM conversion pass).
    w1c = w1 if w1.dtype == compute_dtype else w1.astype(compute_dtype)
    w2c = w2 if w2.dtype == compute_dtype else w2.astype(compute_dtype)
    b1_2d = b1.reshape(1, d_ff).astype(jnp.float32)
    b2_2d = b2.reshape(1, d_model).astype(jnp.float32)

    if d_ff_pad != d_ff:
        pad = d_ff_pad - d_ff
        # Zero-padded d_ff columns/rows contribute exactly 0 to the output.
        w1c = jnp.pad(w1c, ((0, 0), (0, pad)))
        w2c = jnp.pad(w2c, ((0, pad), (0, 0)))
        b1_2d = jnp.pad(b1_2d, ((0, 0), (0, pad)))

    grid = (n_pad // tm_eff, d_ff_pad // tk_eff)

    def weight_spec(shape, index_map):
        if weight_buffers > 2:
            return pl.BlockSpec(shape, index_map,
                                pipeline_mode=pl.Buffered(weight_buffers))
        return pl.BlockSpec(shape, index_map)

    kernel = make_ffn_kernel(n_sub, sub_tk, compute_dtype, use_scratch)
    scratch_shapes = ([pltpu.VMEM((tm_eff, d_model), jnp.float32)]
                      if use_scratch else [])

    out = pl.pallas_call(
        kernel,
        out_shape=jax.ShapeDtypeStruct((n_pad, d_model), out_dtype),
        grid_spec=pltpu.PrefetchScalarGridSpec(
            num_scalar_prefetch=0,
            grid=grid,
            in_specs=[
                pl.BlockSpec((tm_eff, d_model), lambda i, k: (i, 0)),     # x rows
                weight_spec((d_model, tk_eff), lambda i, k: (0, k)),      # W1 chunk
                pl.BlockSpec((1, tk_eff),       lambda i, k: (0, k)),     # b1 chunk
                weight_spec((tk_eff, d_model), lambda i, k: (k, 0)),      # W2 chunk
                pl.BlockSpec((1, d_model),      lambda i, k: (0, 0)),     # b2
            ],
            out_specs=pl.BlockSpec((tm_eff, d_model), lambda i, k: (i, 0)),
            scratch_shapes=scratch_shapes,
        ),
        compiler_params=pltpu.CompilerParams(
            dimension_semantics=("parallel", "arbitrary"),
            vmem_limit_bytes=int(vmem_limit),
        ),
    )(x2d, w1c, b1_2d, w2c, b2_2d)

    return out[:n].reshape(batch, seq, d_model)


def init_params(key, d_model, d_ff, dtype=jnp.float32):
    """Deterministic init matching nn.Linear default (U(-1/sqrt(fan_in), ...))."""
    k1, k2, k3, k4 = jax.random.split(key, 4)
    bound1 = 1.0 / (d_model ** 0.5)
    bound2 = 1.0 / (d_ff ** 0.5)
    # Stored already transposed for x @ W layout: W1 (d_model, d_ff), W2 (d_ff, d_model)
    w1 = jax.random.uniform(k1, (d_model, d_ff), dtype, -bound1, bound1)
    b1 = jax.random.uniform(k2, (d_ff,), dtype, -bound1, bound1)
    w2 = jax.random.uniform(k3, (d_ff, d_model), dtype, -bound2, bound2)
    b2 = jax.random.uniform(k4, (d_model,), dtype, -bound2, bound2)
    return w1, b1, w2, b2


if __name__ == "__main__":
    key = jax.random.PRNGKey(0)
    kx, kp = jax.random.split(key)

    # Small but lane-dense shapes (d_model multiple of 128 keeps stores unmasked).
    batch, seq, d_model, d_ff = 2, 8, 128, 256
    x = jax.random.normal(kx, (batch, seq, d_model), jnp.float32)
    w1, b1, w2, b2 = init_params(kp, d_model, d_ff)

    # Store weights in the MXU compute dtype once, outside the hot path,
    # so the wrapper does not pay a per-call HBM conversion pass.
    w1_c = w1.astype(jnp.bfloat16)
    w2_c = w2.astype(jnp.bfloat16)

    y = positionwise_feed_forward(x, w1_c, b1, w2_c, b2)
    y = jax.block_until_ready(y)

    # Pure-JAX f32 reference (kernel uses bf16 MXU inputs with f32 accumulate,
    # so tolerance is loosened accordingly).
    h_ref = jnp.maximum(x @ w1 + b1, 0.0)
    y_ref = h_ref @ w2 + b2
    assert y.shape == (batch, seq, d_model)
    assert jnp.allclose(y, y_ref, atol=5e-2, rtol=5e-2)

    print("KERNEL_OK")
</pallas_src>

<mosaic_0001>
module attributes {stable_mosaic.version = 11 : i64} {
  func.func @kernel(%arg0: i32, %arg1: i32, %arg2: memref<8x128xf32, #tpu.memory_space<vmem>>, %arg3: memref<128x256xbf16, #tpu.memory_space<vmem>>, %arg4: memref<1x256xf32, #tpu.memory_space<vmem>>, %arg5: memref<256x128xbf16, #tpu.memory_space<vmem>>, %arg6: memref<1x128xf32, #tpu.memory_space<vmem>>, %arg7: memref<8x128xf32, #tpu.memory_space<vmem>>) attributes {dimension_semantics = [#tpu.dimension_semantics<parallel>, #tpu.dimension_semantics<arbitrary>], iteration_bounds = array<i64: 2, 1>, scalar_prefetch = 0 : i64, scratch_operands = 0 : i64, tpu.core_type = #tpu.core_type<tc>, window_params = [{transform_indices = @transform_0, window_bounds = array<i64: 8, 128>}, {transform_indices = @transform_1, window_bounds = array<i64: 128, 256>}, {transform_indices = @transform_2, window_bounds = array<i64: 1, 256>}, {transform_indices = @transform_3, window_bounds = array<i64: 256, 128>}, {pipeline_mode = #tpu.pipeline_mode<synchronous>, transform_indices = @transform_4, window_bounds = array<i64: 1, 128>}, {transform_indices = @transform_5, window_bounds = array<i64: 8, 128>}]} {
    %c0_i32 = arith.constant 0 : i32
    %0 = arith.cmpi eq, %arg1, %c0_i32 : i32
    %1 = arith.extui %0 : i1 to i32
    %c0_i32_0 = arith.constant 0 : i32
    %2 = arith.cmpi ne, %1, %c0_i32_0 : i32
    scf.if %2 {
      %cst_28 = arith.constant 0.000000e+00 : f32
      %34 = vector.broadcast %cst_28 : f32 to vector<8x128xf32>
      %c0_29 = arith.constant 0 : index
      %c0_30 = arith.constant 0 : index
      %35 = vector.load %arg7[%c0_29, %c0_30] : memref<8x128xf32, #tpu.memory_space<vmem>>, vector<8x128xf32>
      tpu.vector_store %arg7[%c0_29, %c0_30], %34 {strides = array<i32>} : memref<8x128xf32, #tpu.memory_space<vmem>>, vector<8x128xf32>,
    } else {
    }
    %c0 = arith.constant 0 : index
    %c0_1 = arith.constant 0 : index
    %3 = vector.load %arg2[%c0, %c0_1] : memref<8x128xf32, #tpu.memory_space<vmem>>, vector<8x128xf32>
    %4 = arith.truncf %3 : vector<8x128xf32> to vector<8x128xbf16>
    %c0_2 = arith.constant 0 : index
    %c0_3 = arith.constant 0 : index
    %5 = vector.load %arg3[%c0_2, %c0_3] : memref<128x256xbf16, #tpu.memory_space<vmem>>, vector<128x128xbf16>
    %cst = arith.constant dense<0.000000e+00> : vector<8x128xf32>
    %6 = tpu.matmul %4, %5, %cst {dimension_numbers = #tpu.dot_dimension_numbers<[1], [0], [0], [1], [0, 0, 1, 1], [], []>} : vector<8x128xbf16>, vector<128x128xbf16>, vector<8x128xf32> -> vector<8x128xf32>
    %c0_4 = arith.constant 0 : index
    %c0_5 = arith.constant 0 : index
    %7 = vector.load %arg4[%c0_4, %c0_5] : memref<1x256xf32, #tpu.memory_space<vmem>>, vector<1x128xf32>
    %8 = vector.broadcast %7 : vector<1x128xf32> to vector<8x128xf32>
    %9 = arith.addf %6, %8 : vector<8x128xf32>
    %cst_6 = arith.constant 0.000000e+00 : f32
    %10 = vector.broadcast %cst_6 : f32 to vector<8x128xf32>
    %11 = arith.maximumf %9, %10 : vector<8x128xf32>
    %c0_7 = arith.constant 0 : index
    %c0_8 = arith.constant 0 : index
    %12 = vector.load %arg7[%c0_7, %c0_8] : memref<8x128xf32, #tpu.memory_space<vmem>>, vector<8x128xf32>
    %13 = arith.truncf %11 : vector<8x128xf32> to vector<8x128xbf16>
    %c0_9 = arith.constant 0 : index
    %c0_10 = arith.constant 0 : index
    %14 = vector.load %arg5[%c0_9, %c0_10] : memref<256x128xbf16, #tpu.memory_space<vmem>>, vector<128x128xbf16>
    %cst_11 = arith.constant dense<0.000000e+00> : vector<8x128xf32>
    %15 = tpu.matmul %13, %14, %cst_11 {dimension_numbers = #tpu.dot_dimension_numbers<[1], [0], [0], [1], [0, 0, 1, 1], [], []>} : vector<8x128xbf16>, vector<128x128xbf16>, vector<8x128xf32> -> vector<8x128xf32>
    %16 = arith.addf %12, %15 : vector<8x128xf32>
    %c0_12 = arith.constant 0 : index
    %c0_13 = arith.constant 0 : index
    %17 = vector.load %arg7[%c0_12, %c0_13] : memref<8x128xf32, #tpu.memory_space<vmem>>, vector<8x128xf32>
    tpu.vector_store %arg7[%c0_12, %c0_13], %16 {strides = array<i32>} : memref<8x128xf32, #tpu.memory_space<vmem>>, vector<8x128xf32>,
    %c0_14 = arith.constant 0 : index
    %c128 = arith.constant 128 : index
    %18 = vector.load %arg3[%c0_14, %c128] : memref<128x256xbf16, #tpu.memory_space<vmem>>, vector<128x128xbf16>
    %cst_15 = arith.constant dense<0.000000e+00> : vector<8x128xf32>
    %19 = tpu.matmul %4, %18, %cst_15 {dimension_numbers = #tpu.dot_dimension_numbers<[1], [0], [0], [1], [0, 0, 1, 1], [], []>} : vector<8x128xbf16>, vector<128x128xbf16>, vector<8x128xf32> -> vector<8x128xf32>
    %c0_16 = arith.constant 0 : index
    %c128_17 = arith.constant 128 : index
    %20 = vector.load %arg4[%c0_16, %c128_17] : memref<1x256xf32, #tpu.memory_space<vmem>>, vector<1x128xf32>
    %21 = vector.broadcast %20 : vector<1x128xf32> to vector<8x128xf32>
    %22 = arith.addf %19, %21 : vector<8x128xf32>
    %cst_18 = arith.constant 0.000000e+00 : f32
    %23 = vector.broadcast %cst_18 : f32 to vector<8x128xf32>
    %24 = arith.maximumf %22, %23 : vector<8x128xf32>
    %c0_19 = arith.constant 0 : index
    %c0_20 = arith.constant 0 : index
    %25 = vector.load %arg7[%c0_19, %c0_20] : memref<8x128xf32, #tpu.memory_space<vmem>>, vector<8x128xf32>
    %26 = arith.truncf %24 : vector<8x128xf32> to vector<8x128xbf16>
    %c128_21 = arith.constant 128 : index
    %c0_22 = arith.constant 0 : index
    %27 = vector.load %arg5[%c128_21, %c0_22] : memref<256x128xbf16, #tpu.memory_space<vmem>>, vector<128x128xbf16>
    %cst_23 = arith.constant dense<0.000000e+00> : vector<8x128xf32>
    %28 = tpu.matmul %26, %27, %cst_23 {dimension_numbers = #tpu.dot_dimension_numbers<[1], [0], [0], [1], [0, 0, 1, 1], [], []>} : vector<8x128xbf16>, vector<128x128xbf16>, vector<8x128xf32> -> vector<8x128xf32>
    %29 = arith.addf %25, %28 : vector<8x128xf32>
    %c0_24 = arith.constant 0 : index
    %c0_25 = arith.constant 0 : index
    %30 = vector.load %arg7[%c0_24, %c0_25] : memref<8x128xf32, #tpu.memory_space<vmem>>, vector<8x128xf32>
    tpu.vector_store %arg7[%c0_24, %c0_25], %29 {strides = array<i32>} : memref<8x128xf32, #tpu.memory_space<vmem>>, vector<8x128xf32>,
    %c0_i32_26 = arith.constant 0 : i32
    %31 = arith.cmpi eq, %arg1, %c0_i32_26 : i32
    %32 = arith.extui %31 : i1 to i32
    %c0_i32_27 = arith.constant 0 : i32
    %33 = arith.cmpi ne, %32, %c0_i32_27 : i32
    scf.if %33 {
      %c0_28 = arith.constant 0 : index
      %c0_29 = arith.constant 0 : index
      %34 = vector.load %arg7[%c0_28, %c0_29] : memref<8x128xf32, #tpu.memory_space<vmem>>, vector<8x128xf32>
      %c0_30 = arith.constant 0 : index
      %c0_31 = arith.constant 0 : index
      %35 = vector.load %arg6[%c0_30, %c0_31] : memref<1x128xf32, #tpu.memory_space<vmem>>, vector<1x128xf32>
      %36 = vector.broadcast %35 : vector<1x128xf32> to vector<8x128xf32>
      %37 = arith.addf %34, %36 : vector<8x128xf32>
      %c0_32 = arith.constant 0 : index
      %c0_33 = arith.constant 0 : index
      %38 = vector.load %arg7[%c0_32, %c0_33] : memref<8x128xf32, #tpu.memory_space<vmem>>, vector<8x128xf32>
      tpu.vector_store %arg7[%c0_32, %c0_33], %37 {strides = array<i32>} : memref<8x128xf32, #tpu.memory_space<vmem>>, vector<8x128xf32>,
    } else {
    }
    return
  }
  func.func @transform_0(%arg0: i32, %arg1: i32) -> (i32, i32) {
    %c0_i32 = arith.constant 0 : i32
    %c0_i32_0 = arith.constant 0 : i32
    return %arg0, %c0_i32 : i32, i32
  }
  func.func @transform_1(%arg0: i32, %arg1: i32) -> (i32, i32) {
    %c0_i32 = arith.constant 0 : i32
    %c0_i32_0 = arith.constant 0 : i32
    return %c0_i32, %arg1 : i32, i32
  }
  func.func @transform_2(%arg0: i32, %arg1: i32) -> (i32, i32) {
    %c0_i32 = arith.constant 0 : i32
    %c0_i32_0 = arith.constant 0 : i32
    return %c0_i32, %arg1 : i32, i32
  }
  func.func @transform_3(%arg0: i32, %arg1: i32) -> (i32, i32) {
    %c0_i32 = arith.constant 0 : i32
    %c0_i32_0 = arith.constant 0 : i32
    return %arg1, %c0_i32 : i32, i32
  }
  func.func @transform_4(%arg0: i32, %arg1: i32) -> (i32, i32) {
    %c0_i32 = arith.constant 0 : i32
    %c0_i32_0 = arith.constant 0 : i32
    %c0_i32_1 = arith.constant 0 : i32
    return %c0_i32, %c0_i32_0 : i32, i32
  }
  func.func @transform_5(%arg0: i32, %arg1: i32) -> (i32, i32) {
    %c0_i32 = arith.constant 0 : i32
    %c0_i32_0 = arith.constant 0 : i32
    return %arg0, %c0_i32 : i32, i32
  }
}

</mosaic_0001>

<bundles_post_ra>
// kernel: tpu_custom_call.1
= control target key start
LH: loop header
LB: loop body
LE: loop exit
PB: predicated region body
PF: predicated region fallthrough
CT: control target
= control target key end

     0   :  { %s1644_s0 = inlined_call_operand.hbm [shape: f32[16,128], index: 0, kind: input, shape index: {}]   ;;  %s1645_s1 = inlined_call_operand.hbm [shape: bf16[128,256], index: 1, kind: input, shape index: {}]   ;;  %s1646_s2 = inlined_call_operand.vmem [shape: f32[1,256], index: 2, kind: input, shape index: {}]   ;;  %s1647_s3 = inlined_call_operand.hbm [shape: bf16[256,128], index: 3, kind: input, shape index: {}]   ;;  %s1648_s4 = inlined_call_operand.vmem [shape: f32[1,128], index: 4, kind: input, shape index: {}]   ;;  %s1649_s5 = inlined_call_operand.hbm [shape: f32[16,128], index: 5, kind: output, shape index: {}]  }
   0x1   :  { %1653 = sst [smem:[#allocation12_spill]] %s1645_s1 }
   0x2   :  { %10 = vsyncpa [#allocation3], 0 }
   0x3   :  { %12 = vsyncpa [#allocation3 + $0x1], 0 }
   0x4   :  { %13 = vsyncpa [#allocation6], 0 }
   0x5   :  { %14 = vsyncpa [#allocation4], 0 }
   0x6   :  { %16 = vsyncpa [#allocation4 + $0x1], 0  ;;  %s1402_s18 = smov 0   ;;  %s1404_s19 = smov 0  }
   0x7   :  { %s1406_s20 = smov 0   ;;  %s1408_s21 = smov 0  }
   0x8   :  { %s1410_s22 = smov 0   ;;  %s1412_s23 = smov 0  }
   0x9 LB: > { %s906_s24 = sadd.s32 4294967295, %s1360_s23   ;;  %s907_s25 = sadd.s32 4294967294, %s1360_s23   ;;  %s1360_s23 = sphi %s1412_s23, %s22_s23   ;;  %s1356_s22 = sphi %s1410_s22, %s1671_s22   ;;  %s1352_s21 = sphi %s1408_s21, %s1670_s21   ;;  %s1348_s20 = sphi %s1406_s20, %s1669_s20   ;;  %s1344_s19 = sphi %s1404_s19, %s1668_s19   ;;  %s1340_s18 = sphi %s1402_s18, %s1667_s18  }
   0xa   : > { %p54_p0 = scmp.ne.s32.totalorder %s1344_s19, %s1340_s18  ;;  %p1436_p1 = scmp.eq.s32.totalorder %s906_s24, 0 }
   0xb   : > { %p1440_p2 = scmp.eq.s32.totalorder %s906_s24, 1  ;;  %p183_p3 = scmp.eq.s32.totalorder %s907_s25, 1 }
   0xc   : > { %s1654_s26 = scalar_select %p1436_p1, 1, 0 }
   0xd   : > { %p1446_p4 = por %p1436_p1, %p54_p0  ;;  %p908_p5 = scmp.ge.s32.totalorder %s1360_s23, 1 }
   0xe   : > { %p1451_p6 = por %p183_p3, %p54_p0  ;;  %p190_p7 = scmp.lt.s32.totalorder %s1360_s23, 3 }
   0xf   : > { %s1656_s28 = scalar_select %p1446_p4, 1, 0 }
  0x10   : > { %s1657_s29 = scalar_select %p1451_p6, 1, 0 }
  0x11   : > { %p1456_p8 = pnand %p908_p5, %p190_p7  ;;  %s1362_s6 = smov [#allocation5]  }
  0x12   : > { %s205_s7 = sshll.u32 %s1362_s6, 4  ;;  %s1363_s9 = smov [#allocation7]   ;;  %s206_s7 = int_to_ptr.vmem [resolvable:$true] %s205_s7 }
  0x13   : > { %p1087_p9 = pneg %p1456_p8  ;;  %s229_s10 = sshll.u32 %s1363_s9, 4  ;;  %s230_s10 = int_to_ptr.vmem [resolvable:$true] %s229_s10 }
  0x14   : > { %s1207_s11 = scalar_lea.vmem %s206_s7, 2048  ;;  %p1215_p5 = scmp.lt.s32.totalorder %s206_s7, %s206_s7 }
  0x15   : > { %p1465_p11 = pnand %p1087_p9, %p1436_p1  ;;  %p1208_p13 = scmp.ne.s32.totalorder %s206_s7, %s1207_s11 }
  0x16   : > { %p1216_p7 = scmp.lt.s32.totalorder %s1207_s11, %s1207_s11 }
  0x17   : > { %p1198_p12 = pneg %p1465_p11 }
  0x18   : > { %p1217_p10 = por %p1216_p7, %p1215_p5 }
  0x19   : > { %p1210_p0 = pnand %p1208_p13, %p1198_p12 }
  0x1b   : > { %p1211_p3 = pneg %p1210_p0 }
  0x1d   : > { %p1218_p9 = pnand %p1217_p10, %p1211_p3 }
  0x1f   : > { %1221 = shalt.err (!%p1218_p9)
}
  0x20   : > { %s1364_s12 = smov 128   ;;  %s1365_s13 = smov 8  }
  0x21   : > { %s1660_s1 = sld [smem:[#allocation12_spill]]  ;;  %s1233_s16 = scalar_lea.vmem %s230_s10, 2048 }
  0x22   : > { %p1234_p6 = scmp.ne.s32.totalorder %s230_s10, %s1233_s16  ;;  %p1241_p1 = scmp.lt.s32.totalorder %s230_s10, %s230_s10 }
  0x23   : > { %p1242_p4 = scmp.lt.s32.totalorder %s1233_s16, %s1233_s16 }
  0x24   : > { %p1236_p13 = pnand %p1234_p6, %p1198_p12 }
  0x25   : > { %p1243_p5 = por %p1242_p4, %p1241_p1 }
  0x26   : > { %p1237_p0 = pneg %p1236_p13 }
  0x27   : > { %1090 = dma.hbm_to_vmem [thread:$0]  (!%p1465_p11), %s1660_s1, 2048, %s206_s7, [#allocation6], %s1364_s12, %s1364_s12, %s1365_s13  }
  0x28   : > { %p1244_p10 = pnand %p1243_p5, %p1237_p0 }
  0x2a   : > { %1247 = shalt.err (!%p1244_p10)
}
  0x2b   : > { %s1366_s17 = smov 64   ;;  %s1367_s24 = smov 4  }
  0x2c   : > { %1093 = dma.hbm_to_vmem [thread:$0]  (!%p1465_p11), %s1647_s3, 2048, %s230_s10, [#allocation6], %s1366_s17, %s1366_s17, %s1367_s24  }
  0x2d   : > { %s34_s7 = sadd.s32 1, %s1356_s22  ;;  %s41_s9 = sadd.s32 1, %s1348_s20 }
  0x2e   : > { %p36_p1 = scmp.ge.s32.totalorder %s34_s7, 2  ;;  %p48_p4 = scmp.ne.s32.totalorder %s1348_s20, %s1344_s19 }
  0x2f   : > { %p49_p6 = scmp.eq.s32.totalorder %s1360_s23, 0  ;;  %p1104_p12 = scmp.lt.s32.totalorder %s1360_s23, 2 }
  0x30   : > { %s1673_s7 = smov (%p36_p1, %s34_s7), 0  ;;  %p1497_p7 = por %p1440_p2, %p48_p4 }
  0x31   : > { %p50_p3 = por %p49_p6, %p48_p4  ;;  %s38_s8 = ssub.s32 %s1356_s22, %s1673_s7 }
  0x32   : > { %s246_s12 = sand.u32 1, %s1348_s20   ;;  %p39_p9 = scmp.eq.s32.totalorder %s38_s8, 0 }
  0x33   : > { %s913_s10 = sshll.u32 %s246_s12, 3  ;;  %s914_s13 = sshll.u32 %s1356_s22, 7 }
  0x34   : > { %s1506_s14 = scalar_select %p39_p9, %s1348_s20, %s41_s9  }
  0x35   : > { %s255_s17 = scalar_lea.hbm %s1644_s0, %s914_s13  ;;  %s250_s24 = scalar_lea.vmem [#allocation2], %s913_s10 }
  0x36   : > { %s257_s25 = sshll.u32 %s250_s24, 4  ;;  %p1513_p11 = pnand %p1104_p12, %p50_p3  ;;  %s258_s25 = int_to_ptr.vmem [resolvable:$true] %s257_s25 }
  0x37   : > { %s247_s6 = scalar_lea.sflag [#allocation3], %s246_s12  ;;  %s1261_s8 = scalar_lea.vmem %s258_s25, 128 }
  0x38   : > { %p1250_p2 = pneg %p1513_p11  ;;  %p1262_p13 = scmp.ne.s32.totalorder %s258_s25, %s1261_s8 }
  0x39   : > { %s1368_s9 = smov [#allocation2]  }
  0x3a   : > { %p1264_p0 = pnand %p1262_p13, %p1250_p2  ;;  %s1266_s1 = sshll.u32 %s1368_s9, 4  ;;  %s1267_s1 = int_to_ptr.vmem [resolvable:$false] %s1266_s1 }
  0x3b   : > { %s1268_s13 = scalar_lea.vmem %s1267_s1, 256  ;;  %p1269_p10 = scmp.lt.s32.totalorder %s258_s25, %s1267_s1 }
  0x3c   : > { %p1265_p5 = pneg %p1264_p0  ;;  %p1270_p1 = scmp.lt.s32.totalorder %s1268_s13, %s1261_s8 }
  0x3e   : > { %p1271_p4 = por %p1270_p1, %p1269_p10 }
  0x40   : > { %p1272_p6 = pnand %p1271_p4, %p1265_p5 }
  0x42   : > { %1275 = shalt.err (!%p1272_p6)
}
  0x43   : > { %1097 = dma.hbm_to_vmem [thread:$0]  (!%p1513_p11), %s255_s17, 128, %s258_s25, %s247_s6  }
  0x44   : > { %266 = sbr.rel (%p1456_p8) target bundleno = 553 (0x229), region = 40  ;;  %s1524_s12 = sand.u32 (!%p1456_p8), 1, %s1344_s19  }
  0x45   : > { %s916_s10 = sshll.u32 (!%p1456_p8), %s1524_s12, 3  ;;  %s269_s15 = scalar_lea.sflag (!%p1456_p8), [#allocation3], %s1524_s12 }
  0x46   : > { %s1530_s1 = scalar_lea.vmem (!%p1456_p8), [#allocation2], %s916_s10  ;;  %p1663_p12 = scmp.ne.s32.totalorder (!%p1456_p8), %s1656_s28, 0 }
  0x49   : > { %1327 = dma.done.wait (%p1663_p12), %s269_s15, 128  }
  0x4a   : > { %1329 = vsyncadd (%p1663_p12), %s269_s15, 4294967168  ;;  %p1664_p3 = scmp.ne.s32.totalorder %s1654_s26, 0 }
  0x4c   : > { %1331 = dma.done.wait (%p1664_p3), [#allocation6], 4096  }
  0x4d   : > { %1333 = vsyncadd (%p1664_p3), [#allocation6], 4294963200  ;;  %v1369_v0 = vmov 0.0   ;;  %vm1370_vm0 = vmmov 0   ;;  %v1164_v1 = vld [vmem:[#allocation5 + $0x70] ss:$8 sps:$4 sm:$0xff]  }
  0x4e   : > { %995 = vmatprep.subr.bf16.mxu0 %v1369_v0  ;;  %1011 = vmatprep.mubr.msk.bf16.mxu0 %vm1370_vm0, %v1369_v0  ;;  %v1165_v2 = vld [vmem:[#allocation5 + $0x60] ss:$8 sps:$4 sm:$0xff]   ;;  %v1166_v3 = vld [vmem:[#allocation5 + $0x50] ss:$8 sps:$4 sm:$0xff]   ;;  %v1172_v15 = vld [vmem:[#allocation5 + $0x74] ss:$8 sps:$4 sm:$0xff]  }
  0x4f   : > { %1015 = vmatprep.subr.bf16.mxu1 %v1369_v0  ;;  %1031 = vmatprep.mubr.msk.bf16.mxu1 %vm1370_vm0, %v1369_v0  ;;  %v1167_v4 = vld [vmem:[#allocation5 + $0x40] ss:$8 sps:$4 sm:$0xff]   ;;  %v1168_v5 = vld [vmem:[#allocation5 + $0x30] ss:$8 sps:$4 sm:$0xff]   ;;  %v1173_v17 = vld [vmem:[#allocation5 + $0x64] ss:$8 sps:$4 sm:$0xff]  }
  0x50   : > { %996 = vmatpush3.bf16.msra.mxu0 %v1164_v1  ;;  %v1180_v6 = vld [vmem:[#allocation7 + $0x38] sm:$0xff]   ;;  %v1169_v7 = vld [vmem:[#allocation5 + $0x20] ss:$8 sps:$4 sm:$0xff]   ;;  %v1181_v8 = vld [vmem:[#allocation7 + $0x30] sm:$0xff]   ;;  %s956_s25 = sshll.u32 %s1352_s21, 7  ;;  %s310_s27 = scalar_lea.vmem [#allocation8], %s916_s10 }
  0x51   : > { %997 = vmatprep.subr.bf16.mxu0 %v1369_v0  ;;  %1016 = vmatpush3.bf16.msra.mxu1 %v1180_v6  ;;  %v1170_v9 = vld [vmem:[#allocation5 + $0x10] ss:$8 sps:$4 sm:$0xff]   ;;  %v1182_v10 = vld [vmem:[#allocation7 + $0x28] sm:$0xff]   ;;  %v1183_v13 = vld [vmem:[#allocation7 + $0x20] sm:$0xff]   ;;  %s793_s6 = sshll.u32 %s310_s27, 4  ;;  %s1596_s13 = scalar_lea.hbm %s1649_s5, %s956_s25  ;;  %s1598_s6 = int_to_ptr.vmem [resolvable:$true] %s793_s6 }
  0x52   : > { %1017 = vmatprep.subr.bf16.mxu1 %v1369_v0  ;;  %v1171_v11 = vld [vmem:[#allocation5] ss:$8 sps:$4 sm:$0xff]   ;;  %v324_v12 = vld [vmem:[%s1530_s1] sm:$0xff]  ;;  %v1175_v20 = vld [vmem:[#allocation5 + $0x44] ss:$8 sps:$4 sm:$0xff]   ;;  %s780_s21 = scalar_lea.sflag [#allocation4], %s1524_s12 }
  0x53   : > { %v325_v14 = vpack.c.bf16 %v324_v12, %v324_v12  ;;  %v1184_v16 = vld [vmem:[#allocation7 + $0x18] sm:$0xff]   ;;  %v1185_v18 = vld [vmem:[#allocation7 + $0x10] sm:$0xff]   ;;  %v1177_v22 = vld [vmem:[#allocation5 + $0x24] ss:$8 sps:$4 sm:$0xff]   ;;  %s1276_s15 = scalar_lea.vmem %s1598_s6, 128  ;;  %s1371_s10 = smov [#allocation8]  }
  0x54   : > { %998 = vmatpush3.bf16.msra.mxu0 %v1165_v2  ;;  %v1174_v19 = vld [vmem:[#allocation5 + $0x54] ss:$8 sps:$4 sm:$0xff]   ;;  %v1179_v24 = vld [vmem:[#allocation5 + $0x4] ss:$8 sps:$4 sm:$0xff]   ;;  %v920_v27 = vld [vmem:[%s1646_s2] ss:$0 sm:$0xff]  ;;  %p1277_p8 = scmp.ne.s32.totalorder %s1598_s6, %s1276_s15 }
  0x55   : > { %999 = vmatprep.subr.bf16.mxu0 %v1369_v0  ;;  %1018 = vmatpush3.bf16.msra.mxu1 %v1181_v8  ;;  %v1176_v21 = vld [vmem:[#allocation5 + $0x34] ss:$8 sps:$4 sm:$0xff]   ;;  %v1186_v25 = vld [vmem:[#allocation7 + $0x8] sm:$0xff]   ;;  %v1187_v26 = vld [vmem:[#allocation7] sm:$0xff]   ;;  %s1280_s1 = sshll.u32 %s1371_s10, 4  ;;  %s1281_s1 = int_to_ptr.vmem [resolvable:$false] %s1280_s1 }
  0x56   : > { %1019 = vmatprep.subr.bf16.mxu1 %v1369_v0  ;;  %v1178_v23 = vld [vmem:[#allocation5 + $0x14] ss:$8 sps:$4 sm:$0xff]   ;;  %v1190_v37 = vld [vmem:[#allocation7 + $0x68] sm:$0xff]   ;;  %v1191_v38 = vld [vmem:[#allocation7 + $0x60] sm:$0xff]   ;;  %p1278_p9 = pnand %p1277_p8, %p1497_p7  ;;  %s1282_s26 = scalar_lea.vmem %s1281_s1, 256 }
  0x57   : > { %v1188_v33 = vld [vmem:[#allocation7 + $0x78] sm:$0xff]   ;;  %v1189_v36 = vld [vmem:[#allocation7 + $0x70] sm:$0xff]   ;;  %v1194_v41 = vld [vmem:[#allocation7 + $0x48] sm:$0xff]   ;;  %p1283_p2 = scmp.lt.s32.totalorder %s1598_s6, %s1281_s1  ;;  %p1284_p13 = scmp.lt.s32.totalorder %s1282_s26, %s1276_s15 }
  0x58   : > { %1000 = vmatpush3.bf16.msra.mxu0 %v1166_v3  ;;  %v1192_v39 = vld [vmem:[#allocation7 + $0x58] sm:$0xff]   ;;  %v1193_v40 = vld [vmem:[#allocation7 + $0x50] sm:$0xff]   ;;  %v1195_v44 = vld [vmem:[#allocation7 + $0x40] sm:$0xff]   ;;  %p1279_p11 = pneg %p1278_p9 }
  0x59   : > { %1001 = vmatprep.subr.bf16.mxu0 %v1369_v0  ;;  %1020 = vmatpush3.bf16.msra.mxu1 %v1182_v10  ;;  %v937_v42 = vld [vmem:[%s1646_s2 + $0x1] ss:$0 sm:$0xff]  ;;  %v954_v56 = vld [vmem:[%s1648_s4] ss:$0 sm:$0xff]  ;;  %p1285_p0 = por %p1284_p13, %p1283_p2 }
  0x5a   : > { %1021 = vmatprep.subr.bf16.mxu1 %v1369_v0 }
  0x5b   : > { %p1286_p5 = pnand %p1285_p0, %p1279_p11 }
  0x5c   : > { %1002 = vmatpush3.bf16.msra.mxu0 %v1167_v4 }
  0x5d   : > { %1003 = vmatprep.subr.bf16.mxu0 %v1369_v0  ;;  %1022 = vmatpush3.bf16.msra.mxu1 %v1183_v13 }
  0x5e   : > { %1023 = vmatprep.subr.bf16.mxu1 %v1369_v0 }
  0x60   : > { %1004 = vmatpush3.bf16.msra.mxu0 %v1168_v5 }
  0x61   : > { %1005 = vmatprep.subr.bf16.mxu0 %v1369_v0  ;;  %1024 = vmatpush3.bf16.msra.mxu1 %v1184_v16 }
  0x62   : > { %1025 = vmatprep.subr.bf16.mxu1 %v1369_v0 }
  0x64   : > { %1006 = vmatpush3.bf16.msra.mxu0 %v1169_v7 }
  0x65   : > { %1007 = vmatprep.subr.bf16.mxu0 %v1369_v0  ;;  %1026 = vmatpush3.bf16.msra.mxu1 %v1185_v18 }
  0x66   : > { %1027 = vmatprep.subr.bf16.mxu1 %v1369_v0 }
  0x68   : > { %1008 = vmatpush3.bf16.msra.mxu0 %v1170_v9 }
  0x69   : > { %1009 = vmatprep.subr.bf16.mxu0 %v1369_v0  ;;  %1028 = vmatpush3.bf16.msra.mxu1 %v1186_v25 }
  0x6a   : > { %1029 = vmatprep.subr.bf16.mxu1 %v1369_v0 }
  0x6c   : > { %1010 = vmatpush3.bf16.msra.mxu0 %v1171_v11 }
  0x6d   : > { %1035 = vmatprep.subr.bf16.mxu0 %v1369_v0  ;;  %1030 = vmatpush3.bf16.msra.mxu1 %v1187_v26 }
  0x6e   : > { %1055 = vmatprep.subr.bf16.mxu1 %v1369_v0 }
  0x6f   : > { %1012 = vmatmul.mubr.bf16.vlgmr.msra.gmra.mxu0 %v325_v14 }
  0x70   : > { %1036 = vmatpush3.bf16.msra.mxu0 %v1172_v15  ;;  %1051 = vmatprep.mubr.msk.bf16.mxu0 %vm1370_vm0, %v1369_v0 }
  0x71   : > { %1037 = vmatprep.subr.bf16.mxu0 %v1369_v0 }
  0x74   : > { %1038 = vmatpush3.bf16.msra.mxu0 %v1173_v17 }
  0x75   : > { %1039 = vmatprep.subr.bf16.mxu0 %v1369_v0 }
  0x78   : > { %1040 = vmatpush3.bf16.msra.mxu0 %v1174_v19 }
  0x79   : > { %1041 = vmatprep.subr.bf16.mxu0 %v1369_v0 }
  0x7c   : > { %1042 = vmatpush3.bf16.msra.mxu0 %v1175_v20 }
  0x7d   : > { %1043 = vmatprep.subr.bf16.mxu0 %v1369_v0 }
  0x80   : > { %1044 = vmatpush3.bf16.msra.mxu0 %v1176_v21 }
  0x81   : > { %1045 = vmatprep.subr.bf16.mxu0 %v1369_v0 }
  0x84   : > { %1046 = vmatpush3.bf16.msra.mxu0 %v1177_v22 }
  0x85   : > { %1047 = vmatprep.subr.bf16.mxu0 %v1369_v0 }
  0x88   : > { %1048 = vmatpush3.bf16.msra.mxu0 %v1178_v23 }
  0x89   : > { %1049 = vmatprep.subr.bf16.mxu0 %v1369_v0 }
  0x8c   : > { %1050 = vmatpush3.bf16.msra.mxu0 %v1179_v24 }
  0x8f   : > { %1052 = vmatmul.mubr.bf16.vlgmr.msra.gmra.mxu0 %v325_v14 }
 0x12f   : > { %v431_v28 = vpop.f32.mrf.mxu0 }
 0x130   : > { %v432_v29 = vadd.f32 %v920_v27, %v431_v28 }
 0x131   : > { %v1013_v30 = vpop.f32.mrf.mxu0 }
 0x132   : > { %v437_v31 = vmax.f32 %v432_v29, 0.0 }
 0x133   : > { %v434_v32 = vpop.f32.mrf.mxu0 }
 0x134   : > { %v439_v34 = vpack.c.bf16 %v437_v31, %v437_v31 }
 0x135   : > { %v1014_v35 = vpop.f32.mrf.mxu0 }
 0x136   : > { %1032 = vmatmul.mubr.bf16.vlgmr.msra.gmra.mxu1 %v439_v34 }
 0x137   : > { %1056 = vmatpush3.bf16.msra.mxu1 %v1188_v33  ;;  %1071 = vmatprep.mubr.msk.bf16.mxu1 %vm1370_vm0, %v1369_v0 }
 0x138   : > { %1057 = vmatprep.subr.bf16.mxu1 %v1369_v0 }
 0x13b   : > { %1058 = vmatpush3.bf16.msra.mxu1 %v1189_v36 }
 0x13c   : > { %1059 = vmatprep.subr.bf16.mxu1 %v1369_v0 }
 0x13f   : > { %1060 = vmatpush3.bf16.msra.mxu1 %v1190_v37 }
 0x140   : > { %1061 = vmatprep.subr.bf16.mxu1 %v1369_v0 }
 0x143   : > { %1062 = vmatpush3.bf16.msra.mxu1 %v1191_v38 }
 0x144   : > { %1063 = vmatprep.subr.bf16.mxu1 %v1369_v0 }
 0x147   : > { %1064 = vmatpush3.bf16.msra.mxu1 %v1192_v39 }
 0x148   : > { %1065 = vmatprep.subr.bf16.mxu1 %v1369_v0 }
 0x14b   : > { %1066 = vmatpush3.bf16.msra.mxu1 %v1193_v40 }
 0x14c   : > { %1067 = vmatprep.subr.bf16.mxu1 %v1369_v0 }
 0x14f   : > { %v651_v43 = vpop.f32.mrf.mxu0  ;;  %1068 = vmatpush3.bf16.msra.mxu1 %v1194_v41 }
 0x150   : > { %v652_v45 = vadd.f32 %v937_v42, %v651_v43  ;;  %1069 = vmatprep.subr.bf16.mxu1 %v1369_v0 }
 0x151   : > { %v1053_v46 = vpop.f32.mrf.mxu0 }
 0x152   : > { %v657_v47 = vmax.f32 %v652_v45, 0.0 }
 0x153   : > { %v654_v48 = vpop.f32.mrf.mxu0  ;;  %1070 = vmatpush3.bf16.msra.mxu1 %v1195_v44 }
 0x154   : > { %v659_v49 = vpack.c.bf16 %v657_v47, %v657_v47 }
 0x155   : > { %v1054_v50 = vpop.f32.mrf.mxu0 }
 0x156   : > { %1072 = vmatmul.mubr.bf16.vlgmr.msra.gmra.mxu1 %v659_v49 }
 0x1f6   : > { %v538_v51 = vpop.f32.mrf.mxu1 }
 0x1f8   : > { %v1033_v52 = vpop.f32.mrf.mxu1 }
 0x1fa   : > { %v541_v53 = vpop.f32.mrf.mxu1 }
 0x1fc   : > { %v1034_v54 = vpop.f32.mrf.mxu1 }
 0x216   : > { %v758_v55 = vpop.f32.mrf.mxu1 }
 0x217   : > { %v764_v57 = vadd.f32 %v758_v55, %v538_v51 }
 0x218   : > { %v1073_v58 = vpop.f32.mrf.mxu1 }
 0x219   : > { %v777_v59 = vadd.f32 %v954_v56, %v764_v57 }
 0x21a   : > { %v761_v60 = vpop.f32.mrf.mxu1 }
 0x21b   : > { %778 = vst [vmem:[%s310_s27] sm:$0xff] %v777_v59 }
 0x21c   : > { %v1074_v61 = vpop.f32.mrf.mxu1 }
 0x21d   : > { %1289 = shalt.err (!%p1286_p5)
}
 0x21e   : > { %s1290_s28 = scalar_lea.hbm %s1596_s13, 128  ;;  %s1294_s16 = scalar_lea.hbm %s1649_s5, 256 }
 0x21f   : > { %p1291_p10 = scmp.ne.s32.totalorder %s1596_s13, %s1290_s28  ;;  %p1295_p6 = scmp.lt.s32.totalorder %s1596_s13, %s1649_s5 }
 0x220   : > { %p1296_p12 = scmp.lt.s32.totalorder %s1294_s16, %s1290_s28 }
 0x221   : > { %p1292_p1 = pnand %p1291_p10, %p1497_p7 }
 0x222   : > { %p1297_p3 = por %p1296_p12, %p1295_p6 }
 0x223   : > { %p1293_p4 = pneg %p1292_p1 }
 0x225   : > { %p1298_p8 = pnand %p1297_p3, %p1293_p4 }
 0x227   : > { %1301 = shalt.err (!%p1298_p8)
}
 0x228   : > { %1085 = dma.vmem_to_hbm [thread:$0]  (%p1497_p7), %s1598_s6, 128, %s1596_s13, %s780_s21  }
 0x229 PF: > { %s805_s25 = sand.u32 1, %s1340_s18   ;;  %p1665_p9 = scmp.ne.s32.totalorder %s1657_s29, 0 }
 0x22a   : > { %p1666_p11 = scmp.ge.s32.totalorder %s1360_s23, 2  ;;  %s806_s27 = scalar_lea.sflag [#allocation4], %s805_s25 }
 0x22c   : > { %p1099_p2 = pnand %p1666_p11, %p1665_p9 }
 0x22e   : > { %p1100_p13 = pneg %p1099_p2 }
 0x230   : > { %1335 = dma.done.wait (%p1100_p13), %s806_s27, 128  }
 0x231   : > { %1337 = vsyncadd (%p1100_p13), %s806_s27, 4294967168  ;;  %s22_s23 = sadd.s32 1, %s1360_s23   ;;  %s1667_s18 = smov %s1344_s19 }
 0x232   : > { %p19_p0 = scmp.ge.s32.totalorder %s22_s23, 4   ;;  %s1668_s19 = smov %s1348_s20 }
 0x233   : > { %s1669_s20 = smov %s1506_s14  ;;  %s1670_s21 = smov %s1356_s22 }
 0x234   : > { %s1671_s22 = smov %s1673_s7  ;;  %21 = sbr.rel (!%p19_p0) target bundleno = 9 (0x9), region = 106 }
 0x239   :  { %811 = vsyncpa [#allocation3], 1 }
 0x23a   :  { %813 = vsyncpa [#allocation3 + $0x1], 1 }
 0x23b   :  { %814 = vsyncpa [#allocation6], 1 }
 0x23c   :  { %815 = vsyncpa [#allocation4], 1 }
 0x23d   :  { %817 = vsyncpa [#allocation4 + $0x1], 1 }

</bundles_post_ra>
